<compile_context>
chip_gen: v7x
topology: tpu7x:2x2x1
jax: 0.10.0
libtpu: 0.0.40
codegen_flags: <defaults>
</compile_context>

<pallas_src>
import functools
import math

import numpy as np
import jax
import jax.numpy as jnp
from jax import lax
from jax.experimental import pallas as pl
from jax.experimental.pallas import tpu as pltpu

# MXU operand dtype.  jnp.bfloat16 is the production choice on v6e/v7x
# (accumulation stays f32 via preferred_element_type); f32 keeps the toy-size
# validation tight.
_MXU_DTYPE = jnp.float32


# -----------------------------------------------------------------------------
# In-kernel building block: conv(stride=1) + folded BN + ReLU + 2x2 maxpool,
# operating on a lane-dense (N, H, W*Cin_pad) slab (last dim multiple of 128).
# -----------------------------------------------------------------------------
def _conv_bn_relu_pool_block(x3d, pad_ref, w_ref, b_ref, *, KH, padH, Ho, WoC):
    """x3d    : (N, H, WC) f32 value, W and (padded) Cin interleaved on lanes.
    pad_ref   : VMEM scratch (N, H + 2*padH, WC) for zero H-padding
                (the W zero-padding is folded into the weight).
    w_ref     : (KH*WC, WoC) scale-folded, pool-permuted row-Toeplitz weight.
    b_ref     : (1, WoC) folded BN bias (zero in padded-channel lanes).
    returns   : pooled activation (N, Ho//2, WoC//2) f32, natural (wq, c) order.
    """
    N, H, WC = x3d.shape
    Hq = Ho // 2
    half = WoC // 2

    # Zero only the halo rows; the interior is fully overwritten just below.
    if padH > 0:
        pad_ref[:, :padH, :] = jnp.zeros((N, padH, WC), jnp.float32)
        pad_ref[:, padH + H:, :] = jnp.zeros((N, padH, WC), jnp.float32)
    pad_ref[:, padH:padH + H, :] = x3d

    # Conv: KH folded into the matmul K dimension -> a single MXU dot.
    # Batch is folded into the M dimension (N*Ho rows).
    lhs = jnp.concatenate(
        [pad_ref[:, kh:kh + Ho, :] for kh in range(KH)], axis=-1
    ).reshape(N * Ho, KH * WC)
    y = jnp.dot(lhs.astype(_MXU_DTYPE), w_ref[...].astype(_MXU_DTYPE),
                preferred_element_type=jnp.float32)

    # Folded BatchNorm bias + ReLU (the BN scale already lives in the weight).
    y = jnp.maximum(y + b_ref[...], 0.0)

    # 2x2 / stride-2 maxpool as two plain VPU maxima:
    #   H: pair-wise row max; W: max of the two contiguous lane halves (the
    #   even/odd-wo column groups were permuted into the halves at fold time).
    y = y.reshape(N, Hq, 2, WoC)
    y = jnp.maximum(y[:, :, 0, :], y[:, :, 1, :])        # (N, Hq, WoC)
    y = jnp.maximum(y[:, :, :half], y[:, :, half:])      # (N, Hq, WoC//2)
    return y


def _range2d_fused_kernel(x_ref, w1_ref, b1_ref, w2_ref, b2_ref,
                          o1_ref, o2_ref, pad1_ref, pad2_ref, *, geom1, geom2):
    KH1, p1, Ho1, WoC1 = geom1
    KH2, p2, Ho2, WoC2 = geom2
    N = x_ref.shape[0]

    # ---- block 1 ----
    y1 = _conv_bn_relu_pool_block(x_ref[...], pad1_ref, w1_ref, b1_ref,
                                  KH=KH1, padH=p1, Ho=Ho1, WoC=WoC1)
    Hq1 = Ho1 // 2
    # (N, Hq1, Wq1*C1p) -> (N*Hq1, Wq1*C1p): layout-preserving, 128-lane rows.
    o1_ref[...] = y1.reshape(N * Hq1, WoC1 // 2).astype(o1_ref.dtype)

    # ---- block 2 (consumes y1 straight from VMEM; it never leaves the chip) --
    y2 = _conv_bn_relu_pool_block(y1, pad2_ref, w2_ref, b2_ref,
                                  KH=KH2, padH=p2, Ho=Ho2, WoC=WoC2)
    Hq2 = Ho2 // 2
    o2_ref[...] = y2.reshape(N * Hq2, WoC2 // 2).astype(o2_ref.dtype)


# -----------------------------------------------------------------------------
# One-time (init) parameter folding: conv weight + BN -> row-Toeplitz matmul
# weight (KH folded into K, BN scale folded into columns, pool-partner column
# permutation) and a lane-tiled bias row.  Pure glue, no per-forward compute.
# -----------------------------------------------------------------------------
def _lane_pad(c, w, lanes=128):
    """Smallest c_pad >= c such that w * c_pad is a multiple of `lanes`."""
    m = lanes // math.gcd(w, lanes)
    return ((c + m - 1) // m) * m


def _fold_block(w_oihw, gamma, beta, rmean, rvar, pad, W_in, Cin_pad, Cout_pad,
                eps=1e-3):
    w = np.asarray(jax.device_get(w_oihw)).astype(np.float32)  # (Cout, Cin, KH, KW)
    Cout, Cin, KH, KW = w.shape
    assert Cin <= Cin_pad and Cout <= Cout_pad
    Wo = W_in + 2 * pad - KW + 1
    assert Wo % 2 == 0, "MaxPool2d(2,2) needs even conv output width"

    gamma, beta, rmean, rvar = (np.asarray(jax.device_get(a), np.float32)
                                for a in (gamma, beta, rmean, rvar))
    scale = gamma / np.sqrt(rvar + eps)
    bias = beta - rmean * scale
    ws = w * scale[:, None, None, None]          # BN scale folded into the weight

    # Pool-partner column permutation: even-wo groups -> lower half lanes
    # [0, (Wo/2)*Cout_pad), odd-wo groups -> upper half; each half in wq order.
    def col0(wo):
        return ((wo % 2) * (Wo // 2) + wo // 2) * Cout_pad

    T = np.zeros((KH, W_in * Cin_pad, Wo * Cout_pad), np.float32)
    for kh in range(KH):
        for wo in range(Wo):
            for kw in range(KW):
                wc = wo + kw - pad               # W zero-padding folded in
                if 0 <= wc < W_in:
                    T[kh, wc * Cin_pad:wc * Cin_pad + Cin,
                      col0(wo):col0(wo) + Cout] = ws[:, :, kh, kw].T
    T = T.reshape(KH * W_in * Cin_pad, Wo * Cout_pad)   # KH folded into K

    b_group = np.zeros((Cout_pad,), np.float32)
    b_group[:Cout] = bias                        # padded channels: bias 0 -> stay 0
    b_row = np.tile(b_group, Wo)[None, :]
    return jnp.asarray(T, _MXU_DTYPE), jnp.asarray(b_row, jnp.float32), Wo


def _build_fused_forward(N, H, W, Cin, Cin_pad, geoms):
    (KH1, p1, Ho1, Wo1, C1, C1p), (KH2, p2, Ho2, Wo2, C2, C2p) = geoms
    Hq1, Wq1 = Ho1 // 2, Wo1 // 2
    Hq2, Wq2 = Ho2 // 2, Wo2 // 2

    kernel = functools.partial(
        _range2d_fused_kernel,
        geom1=(KH1, p1, Ho1, Wo1 * C1p),
        geom2=(KH2, p2, Ho2, Wo2 * C2p))
    vmem = pl.BlockSpec(memory_space=pltpu.MemorySpace.VMEM)

    # TODO(synk): at production rangenet resolutions, add an H-tiled grid with a
    # (KH-1)-row halo index_map, dimension_semantics=("parallel",...) (megacore
    # on v7x) and an explicit vmem_limit_bytes per generation, and switch off
    # the dense row-Toeplitz (O(W^2) weight) to per-kw tap matmuls; at this toy
    # size everything fits VMEM and a grid only adds per-step overhead.
    call = pl.pallas_call(
        kernel,
        out_shape=(jax.ShapeDtypeStruct((N * Hq1, Wq1 * C1p), jnp.float32),
                   jax.ShapeDtypeStruct((N * Hq2, Wq2 * C2p), jnp.float32)),
        in_specs=[vmem] * 5,
        out_specs=(vmem, vmem),
        scratch_shapes=[pltpu.VMEM((N, H + 2 * p1, W * Cin_pad), jnp.float32),
                        pltpu.VMEM((N, Hq1 + 2 * p2, Wq1 * C1p), jnp.float32)],
    )

    @jax.jit
    def fwd(x_nchw, w1, b1, w2, b2):
        # Single boundary transpose NCHW -> lane-dense (N, H, W*Cin_pad) slab.
        x = jnp.transpose(x_nchw, (0, 2, 3, 1))                        # NHWC
        x = jnp.pad(x, ((0, 0), (0, 0), (0, 0), (0, Cin_pad - Cin)))   # Cin pad
        x3d = x.reshape(N, H, W * Cin_pad)
        o1, o2 = call(x3d, w1, b1, w2, b2)
        out1 = jnp.transpose(o1.reshape(N, Hq1, Wq1, C1p)[..., :C1], (0, 3, 1, 2))
        out2 = jnp.transpose(o2.reshape(N, Hq2, Wq2, C2p)[..., :C2], (0, 3, 1, 2))
        return out1, out2                                              # NCHW

    return fwd


# -----------------------------------------------------------------------------
# Range2D module (synthetic, deterministic parameters).
# -----------------------------------------------------------------------------
class Range2D:
    def __init__(self, model_cfg, key):
        self.model_cfg = model_cfg
        input_c = model_cfg["INPUT_C"]
        layer_nums = model_cfg["LAYER_NUM"]
        ksizes = model_cfg["LAYER_STRIDES"]   # used as kernel_size (stride is (1,1))
        num_filters = model_cfg["NUM_FILTERS"]
        num_pad = model_cfg["NUM_PADDING"]
        assert len(layer_nums) == len(num_filters) == len(ksizes) == len(num_pad) == 2
        self.channels = [input_c, *num_filters]
        self.ksizes = list(ksizes)
        self.pads = list(num_pad)

        # Per block: (w_oihw, gamma, beta, running_mean, running_var)
        self.params = []
        for idx in range(2):
            cin, cout, k = self.channels[idx], self.channels[idx + 1], ksizes[idx]
            key, k1, k2, k3, k4, k5 = jax.random.split(key, 6)
            w_oihw = 0.1 * jax.random.normal(k1, (cout, cin, k, k), jnp.float32)
            gamma = 1.0 + 0.05 * jax.random.normal(k2, (cout,), jnp.float32)
            beta = 0.05 * jax.random.normal(k3, (cout,), jnp.float32)
            rmean = 0.05 * jax.random.normal(k4, (cout,), jnp.float32)
            rvar = 1.0 + 0.1 * jax.random.uniform(k5, (cout,), jnp.float32)
            self.params.append((w_oihw, gamma, beta, rmean, rvar))

        self._cache = {}  # (N, H, W) -> (jitted fwd, folded kernel params)

    def _prepare(self, N, H, W):
        ck = (N, H, W)
        if ck in self._cache:
            return self._cache[ck]
        Cin, C1, C2 = self.channels
        k1, k2 = self.ksizes
        p1, p2 = self.pads

        # Channel paddings so every lane-dense slab's last dim is a multiple of 128.
        Cin_pad = _lane_pad(Cin, W)
        Ho1 = H + 2 * p1 - k1 + 1
        Wo1 = W + 2 * p1 - k1 + 1
        assert Ho1 % 2 == 0 and Wo1 % 2 == 0
        Hq1, Wq1 = Ho1 // 2, Wo1 // 2
        C1_pad = _lane_pad(C1, Wq1)     # block-2 input slab width = Wq1*C1_pad

        Ho2 = Hq1 + 2 * p2 - k2 + 1
        Wo2 = Wq1 + 2 * p2 - k2 + 1
        assert Ho2 % 2 == 0 and Wo2 % 2 == 0
        Hq2, Wq2 = Ho2 // 2, Wo2 // 2
        C2_pad = _lane_pad(C2, Wq2)     # output slab width = Wq2*C2_pad

        (w1, g1, be1, m1, v1) = self.params[0]
        T1, b1, wo1 = _fold_block(w1, g1, be1, m1, v1, p1, W, Cin_pad, C1_pad)
        assert wo1 == Wo1
        (w2, g2, be2, m2, v2) = self.params[1]
        T2, b2, wo2 = _fold_block(w2, g2, be2, m2, v2, p2, Wq1, C1_pad, C2_pad)
        assert wo2 == Wo2

        geoms = ((k1, p1, Ho1, Wo1, C1, C1_pad), (k2, p2, Ho2, Wo2, C2, C2_pad))
        fwd = _build_fused_forward(N, H, W, Cin, Cin_pad, geoms)
        prepared = (fwd, (T1, b1, T2, b2))
        self._cache[ck] = prepared
        return prepared

    def forward(self, batch_dict):
        # TODO(synk): training-mode BatchNorm (batch statistics / momentum update)
        # is not implemented; inference running-stats semantics are folded instead.
        x = batch_dict["range_bev"]                       # NCHW, like PyTorch
        N, _, H, W = x.shape
        fwd, folded = self._prepare(N, H, W)
        out1, out2 = fwd(x, *folded)
        batch_dict["range_bev_conv1"] = out1
        batch_dict["range_bev_conv2"] = out2
        return batch_dict


# -----------------------------------------------------------------------------
# Pure-JAX reference mirroring the PyTorch semantics (NCHW), for verification.
# -----------------------------------------------------------------------------
def _ref_block(x_nchw, w_oihw, gamma, beta, rmean, rvar, pad):
    y = lax.conv_general_dilated(
        x_nchw, w_oihw, window_strides=(1, 1),
        padding=[(pad, pad), (pad, pad)],
        dimension_numbers=("NCHW", "OIHW", "NCHW"),
        precision=lax.Precision.HIGHEST,
    )
    scale = gamma / jnp.sqrt(rvar + 1e-3)
    bias = beta - rmean * scale
    y = y * scale[None, :, None, None] + bias[None, :, None, None]
    y = jnp.maximum(y, 0.0)
    y = lax.reduce_window(y, -jnp.inf, lax.max, (1, 1, 2, 2), (1, 1, 2, 2), "VALID")
    return y


if __name__ == "__main__":
    key = jax.random.PRNGKey(0)
    key, kx, kp = jax.random.split(key, 3)

    model_cfg = {
        "INPUT_C": 4,
        "LAYER_NUM": [1, 1],
        "NUM_FILTERS": [8, 16],
        "LAYER_STRIDES": [3, 3],   # used as conv kernel_size (stride is always (1,1))
        "NUM_PADDING": [1, 1],
    }

    x = jax.random.normal(kx, (2, 4, 16, 16), jnp.float32)  # NCHW like PyTorch
    module = Range2D(model_cfg, kp)

    batch_dict = module.forward({"range_bev": x})
    c1 = jax.block_until_ready(batch_dict["range_bev_conv1"])
    c2 = jax.block_until_ready(batch_dict["range_bev_conv2"])

    # Verify against the pure-JAX NCHW reference.
    r = x
    refs = []
    for (w_oihw, gamma, beta, rmean, rvar), pad in zip(module.params, module.pads):
        r = _ref_block(r, w_oihw, gamma, beta, rmean, rvar, pad)
        refs.append(r)

    assert c1.shape == (2, 8, 8, 8) and c2.shape == (2, 16, 4, 4)
    tol = 1e-4 if _MXU_DTYPE == jnp.float32 else 2e-2   # loosen only for bf16 MXU
    assert jnp.allclose(c1, refs[0], rtol=tol, atol=tol), \
        float(jnp.max(jnp.abs(c1 - refs[0])))
    assert jnp.allclose(c2, refs[1], rtol=tol, atol=tol), \
        float(jnp.max(jnp.abs(c2 - refs[1])))

    print("KERNEL_OK")
</pallas_src>

<mosaic_0001>
module attributes {stable_mosaic.version = 11 : i64} {
  func.func @_range2d_fused_kernel(%arg0: memref<2x16x128xf32, #tpu.memory_space<vmem>>, %arg1: memref<384x256xf32, #tpu.memory_space<vmem>>, %arg2: memref<1x256xf32, #tpu.memory_space<vmem>>, %arg3: memref<384x256xf32, #tpu.memory_space<vmem>>, %arg4: memref<1x256xf32, #tpu.memory_space<vmem>>, %arg5: memref<16x128xf32, #tpu.memory_space<vmem>>, %arg6: memref<8x128xf32, #tpu.memory_space<vmem>>, %arg7: memref<2x18x128xf32, #tpu.memory_space<vmem>>, %arg8: memref<2x10x128xf32, #tpu.memory_space<vmem>>) attributes {dimension_semantics = [], scalar_prefetch = 0 : i64, scratch_operands = 2 : i64, tpu.core_type = #tpu.core_type<tc>} {
    %c0 = arith.constant 0 : index
    %c0_0 = arith.constant 0 : index
    %c0_1 = arith.constant 0 : index
    %0 = vector.load %arg0[%c0, %c0_0, %c0_1] : memref<2x16x128xf32, #tpu.memory_space<vmem>>, vector<2x16x128xf32>
    %cst = arith.constant 0.000000e+00 : f32
    %1 = vector.broadcast %cst : f32 to vector<2x1x128xf32>
    %c0_2 = arith.constant 0 : index
    %c0_3 = arith.constant 0 : index
    %c0_4 = arith.constant 0 : index
    %2 = vector.load %arg7[%c0_2, %c0_3, %c0_4] : memref<2x18x128xf32, #tpu.memory_space<vmem>>, vector<2x1x128xf32>
    tpu.vector_store %arg7[%c0_2, %c0_3, %c0_4], %1 {strides = array<i32>} : memref<2x18x128xf32, #tpu.memory_space<vmem>>, vector<2x1x128xf32>,
    %cst_5 = arith.constant 0.000000e+00 : f32
    %3 = vector.broadcast %cst_5 : f32 to vector<2x1x128xf32>
    %c0_6 = arith.constant 0 : index
    %c17 = arith.constant 17 : index
    %c0_7 = arith.constant 0 : index
    %4 = vector.load %arg7[%c0_6, %c17, %c0_7] : memref<2x18x128xf32, #tpu.memory_space<vmem>>, vector<2x1x128xf32>
    tpu.vector_store %arg7[%c0_6, %c17, %c0_7], %3 {strides = array<i32>} : memref<2x18x128xf32, #tpu.memory_space<vmem>>, vector<2x1x128xf32>,
    %c0_8 = arith.constant 0 : index
    %c1 = arith.constant 1 : index
    %c0_9 = arith.constant 0 : index
    %5 = vector.load %arg7[%c0_8, %c1, %c0_9] : memref<2x18x128xf32, #tpu.memory_space<vmem>>, vector<2x16x128xf32>
    tpu.vector_store %arg7[%c0_8, %c1, %c0_9], %0 {strides = array<i32>} : memref<2x18x128xf32, #tpu.memory_space<vmem>>, vector<2x16x128xf32>,
    %c0_10 = arith.constant 0 : index
    %c0_11 = arith.constant 0 : index
    %c0_12 = arith.constant 0 : index
    %6 = vector.load %arg7[%c0_10, %c0_11, %c0_12] : memref<2x18x128xf32, #tpu.memory_space<vmem>>, vector<2x16x128xf32>
    %c0_13 = arith.constant 0 : index
    %c1_14 = arith.constant 1 : index
    %c0_15 = arith.constant 0 : index
    %7 = vector.load %arg7[%c0_13, %c1_14, %c0_15] : memref<2x18x128xf32, #tpu.memory_space<vmem>>, vector<2x16x128xf32>
    %c0_16 = arith.constant 0 : index
    %c2 = arith.constant 2 : index
    %c0_17 = arith.constant 0 : index
    %8 = vector.load %arg7[%c0_16, %c2, %c0_17] : memref<2x18x128xf32, #tpu.memory_space<vmem>>, vector<2x16x128xf32>
    %9 = tpu.concatenate %6, %7, %8 in 2 : vector<2x16x128xf32>, vector<2x16x128xf32>, vector<2x16x128xf32> -> vector<2x16x384xf32>
    %10 = vector.shape_cast %9 : vector<2x16x384xf32> to vector<32x384xf32>
    %c0_18 = arith.constant 0 : index
    %c0_19 = arith.constant 0 : index
    %11 = vector.load %arg1[%c0_18, %c0_19] : memref<384x256xf32, #tpu.memory_space<vmem>>, vector<384x256xf32>
    %cst_20 = arith.constant dense<0.000000e+00> : vector<32x256xf32>
    %12 = tpu.matmul %10, %11, %cst_20 {dimension_numbers = #tpu.dot_dimension_numbers<[1], [0], [0], [1], [0, 0, 1, 1], [], []>} : vector<32x384xf32>, vector<384x256xf32>, vector<32x256xf32> -> vector<32x256xf32>
    %c0_21 = arith.constant 0 : index
    %c0_22 = arith.constant 0 : index
    %13 = vector.load %arg2[%c0_21, %c0_22] : memref<1x256xf32, #tpu.memory_space<vmem>>, vector<1x256xf32>
    %14 = vector.broadcast %13 : vector<1x256xf32> to vector<32x256xf32>
    %15 = arith.addf %12, %14 : vector<32x256xf32>
    %cst_23 = arith.constant 0.000000e+00 : f32
    %16 = vector.broadcast %cst_23 : f32 to vector<32x256xf32>
    %17 = arith.maximumf %15, %16 : vector<32x256xf32>
    %18 = vector.shape_cast %17 : vector<32x256xf32> to vector<2x8x2x256xf32>
    %19 = vector.extract_strided_slice %18 {offsets = [0, 0, 0, 0], sizes = [2, 8, 1, 256], strides = [1, 1, 1, 1]} : vector<2x8x2x256xf32> to vector<2x8x1x256xf32>
    %20 = vector.shape_cast %19 : vector<2x8x1x256xf32> to vector<2x8x256xf32>
    %21 = vector.extract_strided_slice %18 {offsets = [0, 0, 1, 0], sizes = [2, 8, 1, 256], strides = [1, 1, 1, 1]} : vector<2x8x2x256xf32> to vector<2x8x1x256xf32>
    %22 = vector.shape_cast %21 : vector<2x8x1x256xf32> to vector<2x8x256xf32>
    %23 = arith.maximumf %20, %22 : vector<2x8x256xf32>
    %24 = vector.extract_strided_slice %23 {offsets = [0, 0, 0], sizes = [2, 8, 128], strides = [1, 1, 1]} : vector<2x8x256xf32> to vector<2x8x128xf32>
    %25 = vector.extract_strided_slice %23 {offsets = [0, 0, 128], sizes = [2, 8, 128], strides = [1, 1, 1]} : vector<2x8x256xf32> to vector<2x8x128xf32>
    %26 = arith.maximumf %24, %25 : vector<2x8x128xf32>
    %27 = vector.shape_cast %26 : vector<2x8x128xf32> to vector<16x128xf32>
    %c0_24 = arith.constant 0 : index
    %c0_25 = arith.constant 0 : index
    %28 = vector.load %arg5[%c0_24, %c0_25] : memref<16x128xf32, #tpu.memory_space<vmem>>, vector<16x128xf32>
    tpu.vector_store %arg5[%c0_24, %c0_25], %27 {strides = array<i32>} : memref<16x128xf32, #tpu.memory_space<vmem>>, vector<16x128xf32>,
    %cst_26 = arith.constant 0.000000e+00 : f32
    %29 = vector.broadcast %cst_26 : f32 to vector<2x1x128xf32>
    %c0_27 = arith.constant 0 : index
    %c0_28 = arith.constant 0 : index
    %c0_29 = arith.constant 0 : index
    %30 = vector.load %arg8[%c0_27, %c0_28, %c0_29] : memref<2x10x128xf32, #tpu.memory_space<vmem>>, vector<2x1x128xf32>
    tpu.vector_store %arg8[%c0_27, %c0_28, %c0_29], %29 {strides = array<i32>} : memref<2x10x128xf32, #tpu.memory_space<vmem>>, vector<2x1x128xf32>,
    %cst_30 = arith.constant 0.000000e+00 : f32
    %31 = vector.broadcast %cst_30 : f32 to vector<2x1x128xf32>
    %c0_31 = arith.constant 0 : index
    %c9 = arith.constant 9 : index
    %c0_32 = arith.constant 0 : index
    %32 = vector.load %arg8[%c0_31, %c9, %c0_32] : memref<2x10x128xf32, #tpu.memory_space<vmem>>, vector<2x1x128xf32>
    tpu.vector_store %arg8[%c0_31, %c9, %c0_32], %31 {strides = array<i32>} : memref<2x10x128xf32, #tpu.memory_space<vmem>>, vector<2x1x128xf32>,
    %c0_33 = arith.constant 0 : index
    %c1_34 = arith.constant 1 : index
    %c0_35 = arith.constant 0 : index
    %33 = vector.load %arg8[%c0_33, %c1_34, %c0_35] : memref<2x10x128xf32, #tpu.memory_space<vmem>>, vector<2x8x128xf32>
    tpu.vector_store %arg8[%c0_33, %c1_34, %c0_35], %26 {strides = array<i32>} : memref<2x10x128xf32, #tpu.memory_space<vmem>>, vector<2x8x128xf32>,
    %c0_36 = arith.constant 0 : index
    %c0_37 = arith.constant 0 : index
    %c0_38 = arith.constant 0 : index
    %34 = vector.load %arg8[%c0_36, %c0_37, %c0_38] : memref<2x10x128xf32, #tpu.memory_space<vmem>>, vector<2x8x128xf32>
    %c0_39 = arith.constant 0 : index
    %c1_40 = arith.constant 1 : index
    %c0_41 = arith.constant 0 : index
    %35 = vector.load %arg8[%c0_39, %c1_40, %c0_41] : memref<2x10x128xf32, #tpu.memory_space<vmem>>, vector<2x8x128xf32>
    %c0_42 = arith.constant 0 : index
    %c2_43 = arith.constant 2 : index
    %c0_44 = arith.constant 0 : index
    %36 = vector.load %arg8[%c0_42, %c2_43, %c0_44] : memref<2x10x128xf32, #tpu.memory_space<vmem>>, vector<2x8x128xf32>
    %37 = tpu.concatenate %34, %35, %36 in 2 : vector<2x8x128xf32>, vector<2x8x128xf32>, vector<2x8x128xf32> -> vector<2x8x384xf32>
    %38 = vector.shape_cast %37 : vector<2x8x384xf32> to vector<16x384xf32>
    %c0_45 = arith.constant 0 : index
    %c0_46 = arith.constant 0 : index
    %39 = vector.load %arg3[%c0_45, %c0_46] : memref<384x256xf32, #tpu.memory_space<vmem>>, vector<384x256xf32>
    %cst_47 = arith.constant dense<0.000000e+00> : vector<16x256xf32>
    %40 = tpu.matmul %38, %39, %cst_47 {dimension_numbers = #tpu.dot_dimension_numbers<[1], [0], [0], [1], [0, 0, 1, 1], [], []>} : vector<16x384xf32>, vector<384x256xf32>, vector<16x256xf32> -> vector<16x256xf32>
    %c0_48 = arith.constant 0 : index
    %c0_49 = arith.constant 0 : index
    %41 = vector.load %arg4[%c0_48, %c0_49] : memref<1x256xf32, #tpu.memory_space<vmem>>, vector<1x256xf32>
    %42 = vector.broadcast %41 : vector<1x256xf32> to vector<16x256xf32>
    %43 = arith.addf %40, %42 : vector<16x256xf32>
    %cst_50 = arith.constant 0.000000e+00 : f32
    %44 = vector.broadcast %cst_50 : f32 to vector<16x256xf32>
    %45 = arith.maximumf %43, %44 : vector<16x256xf32>
    %46 = vector.shape_cast %45 : vector<16x256xf32> to vector<2x4x2x256xf32>
    %47 = vector.extract_strided_slice %46 {offsets = [0, 0, 0, 0], sizes = [2, 4, 1, 256], strides = [1, 1, 1, 1]} : vector<2x4x2x256xf32> to vector<2x4x1x256xf32>
    %48 = vector.shape_cast %47 : vector<2x4x1x256xf32> to vector<2x4x256xf32>
    %49 = vector.extract_strided_slice %46 {offsets = [0, 0, 1, 0], sizes = [2, 4, 1, 256], strides = [1, 1, 1, 1]} : vector<2x4x2x256xf32> to vector<2x4x1x256xf32>
    %50 = vector.shape_cast %49 : vector<2x4x1x256xf32> to vector<2x4x256xf32>
    %51 = arith.maximumf %48, %50 : vector<2x4x256xf32>
    %52 = vector.extract_strided_slice %51 {offsets = [0, 0, 0], sizes = [2, 4, 128], strides = [1, 1, 1]} : vector<2x4x256xf32> to vector<2x4x128xf32>
    %53 = vector.extract_strided_slice %51 {offsets = [0, 0, 128], sizes = [2, 4, 128], strides = [1, 1, 1]} : vector<2x4x256xf32> to vector<2x4x128xf32>
    %54 = arith.maximumf %52, %53 : vector<2x4x128xf32>
    %55 = vector.shape_cast %54 : vector<2x4x128xf32> to vector<8x128xf32>
    %c0_51 = arith.constant 0 : index
    %c0_52 = arith.constant 0 : index
    %56 = vector.load %arg6[%c0_51, %c0_52] : memref<8x128xf32, #tpu.memory_space<vmem>>, vector<8x128xf32>
    tpu.vector_store %arg6[%c0_51, %c0_52], %55 {strides = array<i32>} : memref<8x128xf32, #tpu.memory_space<vmem>>, vector<8x128xf32>,
    return
  }
}

</mosaic_0001>

<bundles_post_ra>
// kernel: fwd.1
= control target key start
LH: loop header
LB: loop body
LE: loop exit
PB: predicated region body
PF: predicated region fallthrough
CT: control target
= control target key end

     0   :  { %12 = vsyncpa [#allocation5], 0  ;;  %s1400_s21 = smov [#allocation4]   ;;  %s1877_s0 = inlined_call_operand.vmem [shape: f32[2,16,128], index: 0, kind: input, shape index: {}]   ;;  %s1878_s1 = inlined_call_operand.vmem [shape: f32[384,256], index: 1, kind: input, shape index: {}]   ;;  %s1879_s2 = inlined_call_operand.vmem [shape: f32[1,256], index: 2, kind: input, shape index: {}]   ;;  %s1880_s3 = inlined_call_operand.hbm [shape: f32[384,256], index: 3, kind: input, shape index: {}]   ;;  %s1881_s4 = inlined_call_operand.vmem [shape: f32[1,256], index: 4, kind: input, shape index: {}]   ;;  %s1882_s5 = inlined_call_operand.vmem [shape: f32[16,128], index: 5, kind: output, shape index: {0}]   ;;  %s1883_s6 = inlined_call_operand.vmem [shape: f32[8,128], index: 6, kind: output, shape index: {1}]  }
   0x1   :  { %s24_s22 = sshll.u32 %s1400_s21, 4  ;;  %s1376_s25 = scalar_lea.hbm %s1880_s3, 12288  ;;  %s25_s22 = int_to_ptr.vmem [resolvable:$true] %s24_s22 }
   0x2   :  { %p1377_p0 = scmp.ne.s32.totalorder %s1880_s3, %s1376_s25  ;;  %p1380_p1 = scmp.lt.u32.totalorder %s1376_s25, %s1880_s3 }
   0x4   :  { %p1382_p2 = pnand %p1380_p1, %p1377_p0 }
   0x6   :  { %1385 = shalt.err (!%p1382_p2)
}
   0x7   :  { %s1386_s30 = scalar_lea.vmem %s25_s22, 12288  ;;  %p1391_p4 = scmp.lt.s32.totalorder %s25_s22, %s25_s22 }
   0x8   :  { %p1387_p3 = scmp.ne.s32.totalorder %s25_s22, %s1386_s30  ;;  %p1392_p5 = scmp.lt.s32.totalorder %s1386_s30, %s1386_s30 }
   0xa   :  { %p1393_p6 = por %p1392_p5, %p1391_p4 }
   0xc   :  { %p1394_p7 = pnand %p1393_p6, %p1387_p3 }
   0xe   :  { %1397 = shalt.err (!%p1394_p7)
}
   0xf   :  { %s1401_s7 = smov 256   ;;  %s1402_s8 = smov 16  }
  0x10   :  { %30 = dma.hbm_to_vmem [thread:$0]  %s1880_s3, 12288, %s25_s22, [#allocation5], %s1401_s7, %s1401_s7, %s1402_s8  }
  0x11   :  { %1398 = dma.done.wait [#allocation5], 12288  }
  0x12   :  { %1399 = vsyncadd [#allocation5], 4294955008  ;;  %v1403_v0 = vmov 0.0   ;;  %v61_v1 = vld [vmem:[%s1878_s1 + $0x8] sm:$0xff]  ;;  %v63_v2 = vld [vmem:[%s1878_s1 + $0x18] sm:$0xff]  ;;  %vm658_vm0 = vcmask 1041409  }
  0x13   :  { %40 = vst [vmem:[#allocation2] sm:$0x1] %v1403_v0  ;;  %41 = vst [vmem:[#allocation2 + $0x18] sm:$0x1] %v1403_v0  ;;  %v60_v3 = vld [vmem:[%s1878_s1] sm:$0xff]  ;;  %v1155_v4 = vpack.c.bf16 %v63_v2, %v61_v1  ;;  %v62_v5 = vld [vmem:[%s1878_s1 + $0x10] sm:$0xff] }
  0x14   :  { %42 = vst [vmem:[#allocation2 + $0x11] sm:$0x1] %v1403_v0  ;;  %43 = vst [vmem:[#allocation2 + $0x29] sm:$0x1] %v1403_v0  ;;  %v65_v6 = vld [vmem:[%s1878_s1 + $0x28] sm:$0xff]  ;;  %v67_v7 = vld [vmem:[%s1878_s1 + $0x38] sm:$0xff]  ;;  %v1157_v8 = vpack.c.bf16 %v62_v5, %v60_v3 }
  0x15   :  { %683 = vst [vmem:[#allocation3] sm:$0x1] %v1403_v0  ;;  %684 = vst [vmem:[#allocation3 + $0x10] sm:$0x1] %v1403_v0  ;;  %v1159_v9 = vpack.c.bf16 %v67_v7, %v65_v6  ;;  %v64_v10 = vld [vmem:[%s1878_s1 + $0x20] sm:$0xff]  ;;  %v66_v11 = vld [vmem:[%s1878_s1 + $0x30] sm:$0xff]  ;;  %1156 = vmatprep.subr.bf16.mxu0 %v1155_v4 }
  0x16   :  { %685 = vst [vmem:[#allocation3 + $0x9] sm:$0x1] %v1403_v0  ;;  %686 = vst [vmem:[#allocation3 + $0x19] sm:$0x1] %v1403_v0  ;;  %v69_v12 = vld [vmem:[%s1878_s1 + $0x48] sm:$0xff]  ;;  %v71_v13 = vld [vmem:[%s1878_s1 + $0x58] sm:$0xff]  ;;  %1158 = vmatpush1.bf16.msra.mxu0 %v1157_v8  ;;  %v1161_v14 = vpack.c.bf16 %v66_v11, %v64_v10 }
  0x17   :  { %1160 = vmatprep.subr.bf16.mxu0 %v1159_v9  ;;  %v1163_v15 = vpack.c.bf16 %v71_v13, %v69_v12  ;;  %v68_v16 = vld [vmem:[%s1878_s1 + $0x40] sm:$0xff]  ;;  %v70_v17 = vld [vmem:[%s1878_s1 + $0x50] sm:$0xff]  ;;  %v73_v18 = vld [vmem:[%s1878_s1 + $0x68] sm:$0xff]  ;;  %vm660_vm1 = vcmask 1042434   ;;  %vm662_vm2 = vcmask 1043459   ;;  %vm664_vm3 = vcmask 1044484  }
  0x18   :  { %v75_v19 = vld [vmem:[%s1878_s1 + $0x78] sm:$0xff]  ;;  %v1165_v20 = vpack.c.bf16 %v70_v17, %v68_v16  ;;  %v72_v22 = vld [vmem:[%s1878_s1 + $0x60] sm:$0xff]  ;;  %v74_v23 = vld [vmem:[%s1878_s1 + $0x70] sm:$0xff]  ;;  %vm666_vm4 = vcmask 1045509   ;;  %vm668_vm5 = vcmask 1046534   ;;  %vm670_vm6 = vcmask 1047559  }
  0x19   :  { %v1167_v21 = vpack.c.bf16 %v75_v19, %v73_v18  ;;  %v77_v24 = vld [vmem:[%s1878_s1 + $0x88] sm:$0xff]  ;;  %v79_v25 = vld [vmem:[%s1878_s1 + $0x98] sm:$0xff]  ;;  %v1169_v26 = vpack.c.bf16 %v74_v23, %v72_v22  ;;  %v76_v28 = vld [vmem:[%s1878_s1 + $0x80] sm:$0xff] }
  0x1a   :  { %1162 = vmatpush1.bf16.msra.mxu0 %v1161_v14  ;;  %v1171_v27 = vpack.c.bf16 %v79_v25, %v77_v24  ;;  %v78_v29 = vld [vmem:[%s1878_s1 + $0x90] sm:$0xff]  ;;  %v81_v30 = vld [vmem:[%s1878_s1 + $0xa8] sm:$0xff]  ;;  %v83_v31 = vld [vmem:[%s1878_s1 + $0xb8] sm:$0xff] }
  0x1b   :  { %1164 = vmatprep.subr.bf16.mxu0 %v1163_v15  ;;  %v1173_v32 = vpack.c.bf16 %v78_v29, %v76_v28  ;;  %v1175_v33 = vpack.c.bf16 %v83_v31, %v81_v30  ;;  %v80_v34 = vld [vmem:[%s1878_s1 + $0xa0] sm:$0xff]  ;;  %v82_v35 = vld [vmem:[%s1878_s1 + $0xb0] sm:$0xff]  ;;  %v85_v36 = vld [vmem:[%s1878_s1 + $0xc8] sm:$0xff] }
  0x1c   :  { %v87_v37 = vld [vmem:[%s1878_s1 + $0xd8] sm:$0xff]  ;;  %v1177_v38 = vpack.c.bf16 %v82_v35, %v80_v34  ;;  %v84_v40 = vld [vmem:[%s1878_s1 + $0xc0] sm:$0xff]  ;;  %v86_v41 = vld [vmem:[%s1878_s1 + $0xd0] sm:$0xff] }
  0x1d   :  { %v1179_v39 = vpack.c.bf16 %v87_v37, %v85_v36  ;;  %v36_v42 = vld [vmem:[%s1877_s0] sm:$0xff]  ;;  %v89_v43 = vld [vmem:[%s1878_s1 + $0xe8] sm:$0xff]  ;;  %v91_v44 = vld [vmem:[%s1878_s1 + $0xf8] sm:$0xff]  ;;  %v1181_v45 = vpack.c.bf16 %v86_v41, %v84_v40 }
  0x1e   :  { %1166 = vmatpush1.bf16.msra.mxu0 %v1165_v20  ;;  %44 = vst [vmem:[#allocation2 + $0x1] sm:$0xff] %v36_v42  ;;  %232 = vmatprep.mubr.f32.mxu0 %v36_v42  ;;  %v1183_v46 = vpack.c.bf16 %v91_v44, %v89_v43  ;;  %v88_v47 = vld [vmem:[%s1878_s1 + $0xe0] sm:$0xff]  ;;  %v90_v48 = vld [vmem:[%s1878_s1 + $0xf0] sm:$0xff]  ;;  %v93_v49 = vld [vmem:[%s1878_s1 + $0x108] sm:$0xff] }
  0x1f   :  { %1168 = vmatprep.subr.bf16.mxu0 %v1167_v21  ;;  %v95_v50 = vld [vmem:[%s1878_s1 + $0x118] sm:$0xff]  ;;  %v1185_v51 = vpack.c.bf16 %v90_v48, %v88_v47  ;;  %v1568_v52 = vld [vmem:[%s1877_s0 + $0x8] sm:$0xff]  ;;  %v92_v54 = vld [vmem:[%s1878_s1 + $0x100] sm:$0xff] }
  0x20   :  { %v1187_v53 = vpack.c.bf16 %v95_v50, %v93_v49  ;;  %v94_v55 = vld [vmem:[%s1878_s1 + $0x110] sm:$0xff]  ;;  %45 = vst [vmem:[#allocation2 + $0x9] sm:$0xff] %v1568_v52  ;;  %v97_v56 = vld [vmem:[%s1878_s1 + $0x128] sm:$0xff]  ;;  %v99_v57 = vld [vmem:[%s1878_s1 + $0x138] sm:$0xff] }
  0x21   :  { %v1586_v58 = vld [vmem:[%s1877_s0 + $0x10] sm:$0xff]  ;;  %v1189_v59 = vpack.c.bf16 %v94_v55, %v92_v54  ;;  %v96_v60 = vld [vmem:[%s1878_s1 + $0x120] sm:$0xff]  ;;  %v1598_v62 = vld [vmem:[%s1877_s0 + $0x18] sm:$0xff]  ;;  %v1191_v63 = vpack.c.bf16 %v99_v57, %v97_v56 }
  0x22   :  { %1170 = vmatpush1.bf16.msra.mxu0 %v1169_v26  ;;  %46 = vst [vmem:[#allocation2 + $0x19] sm:$0xff] %v1586_v58  ;;  %v98_v61 = vld [vmem:[%s1878_s1 + $0x130] sm:$0xff]  ;;  %v101_v1 = vld [vmem:[%s1878_s1 + $0x148] sm:$0xff]  ;;  %v103_v2 = vld [vmem:[%s1878_s1 + $0x158] sm:$0xff] }
  0x23   :  { %1172 = vmatprep.subr.bf16.mxu0 %v1171_v27  ;;  %47 = vst [vmem:[#allocation2 + $0x21] sm:$0xff] %v1598_v62  ;;  %v696_v3 = vld [vmem:[#allocation4 + $0x8] sm:$0xff]  ;;  %v698_v4 = vld [vmem:[#allocation4 + $0x18] sm:$0xff]  ;;  %v695_v5 = vld [vmem:[#allocation4] sm:$0xff]  ;;  %v1193_v12 = vpack.c.bf16 %v98_v61, %v96_v60  ;;  %v1195_v16 = vpack.c.bf16 %v103_v2, %v101_v1 }
  0x24   :  { %v697_v6 = vld [vmem:[#allocation4 + $0x10] sm:$0xff]  ;;  %v1251_v7 = vpack.c.bf16 %v698_v4, %v696_v3  ;;  %v700_v9 = vld [vmem:[#allocation4 + $0x28] sm:$0xff]  ;;  %v702_v10 = vld [vmem:[#allocation4 + $0x38] sm:$0xff] }
  0x25   :  { %v1253_v8 = vpack.c.bf16 %v697_v6, %v695_v5  ;;  %v699_v11 = vld [vmem:[#allocation4 + $0x20] sm:$0xff]  ;;  %v100_v13 = vld [vmem:[%s1878_s1 + $0x140] sm:$0xff]  ;;  %v1255_v15 = vpack.c.bf16 %v702_v10, %v700_v9  ;;  %v704_v18 = vld [vmem:[#allocation4 + $0x48] sm:$0xff] }
  0x26   :  { %1174 = vmatpush1.bf16.msra.mxu0 %v1173_v32  ;;  %v102_v14 = vld [vmem:[%s1878_s1 + $0x150] sm:$0xff]  ;;  %1252 = vmatprep.subr.bf16.mxu1 %v1251_v7  ;;  %v701_v17 = vld [vmem:[#allocation4 + $0x30] sm:$0xff]  ;;  %v706_v19 = vld [vmem:[#allocation4 + $0x58] sm:$0xff] }
  0x27   :  { %1176 = vmatprep.subr.bf16.mxu0 %v1175_v33  ;;  %v105_v20 = vld [vmem:[%s1878_s1 + $0x168] sm:$0xff]  ;;  %v107_v21 = vld [vmem:[%s1878_s1 + $0x178] sm:$0xff]  ;;  %1254 = vmatpush1.bf16.msra.mxu1 %v1253_v8  ;;  %v1257_v22 = vpack.c.bf16 %v701_v17, %v699_v11  ;;  %v1259_v23 = vpack.c.bf16 %v706_v19, %v704_v18  ;;  %v703_v24 = vld [vmem:[#allocation4 + $0x40] sm:$0xff]  ;;  %v1197_v26 = vpack.c.bf16 %v102_v14, %v100_v13 }
  0x28   :  { %1256 = vmatprep.subr.bf16.mxu1 %v1255_v15  ;;  %v705_v25 = vld [vmem:[#allocation4 + $0x50] sm:$0xff]  ;;  %v708_v27 = vld [vmem:[#allocation4 + $0x68] sm:$0xff]  ;;  %v710_v28 = vld [vmem:[#allocation4 + $0x78] sm:$0xff]  ;;  %v1199_v29 = vpack.c.bf16 %v107_v21, %v105_v20 }
  0x29   :  { %v104_v30 = vld [vmem:[%s1878_s1 + $0x160] sm:$0xff]  ;;  %v106_v31 = vld [vmem:[%s1878_s1 + $0x170] sm:$0xff]  ;;  %v109_v32 = vld [vmem:[%s1878_s1 + $0x188] sm:$0xff]  ;;  %v1261_v34 = vpack.c.bf16 %v705_v25, %v703_v24  ;;  %v1263_v35 = vpack.c.bf16 %v710_v28, %v708_v27 }
  0x2a   :  { %1178 = vmatpush1.bf16.msra.mxu0 %v1177_v38  ;;  %v111_v33 = vld [vmem:[%s1878_s1 + $0x198] sm:$0xff]  ;;  %v707_v36 = vld [vmem:[#allocation4 + $0x60] sm:$0xff]  ;;  %v709_v37 = vld [vmem:[#allocation4 + $0x70] sm:$0xff]  ;;  %v1201_v38 = vpack.c.bf16 %v106_v31, %v104_v30 }
  0x2b   :  { %1180 = vmatprep.subr.bf16.mxu0 %v1179_v39  ;;  %1258 = vmatpush1.bf16.msra.mxu1 %v1257_v22  ;;  %v712_v39 = vld [vmem:[#allocation4 + $0x88] sm:$0xff]  ;;  %v714_v40 = vld [vmem:[#allocation4 + $0x98] sm:$0xff]  ;;  %v1203_v41 = vpack.c.bf16 %v111_v33, %v109_v32  ;;  %v108_v42 = vld [vmem:[%s1878_s1 + $0x180] sm:$0xff] }
  0x2c   :  { %1260 = vmatprep.subr.bf16.mxu1 %v1259_v23  ;;  %v110_v43 = vld [vmem:[%s1878_s1 + $0x190] sm:$0xff]  ;;  %v113_v44 = vld [vmem:[%s1878_s1 + $0x1a8] sm:$0xff]  ;;  %v1267_v47 = vpack.c.bf16 %v714_v40, %v712_v39  ;;  %v713_v49 = vld [vmem:[#allocation4 + $0x90] sm:$0xff] }
  0x2d   :  { %v711_v48 = vld [vmem:[#allocation4 + $0x80] sm:$0xff]  ;;  %v1205_v50 = vpack.c.bf16 %v110_v43, %v108_v42  ;;  %v112_v55 = vld [vmem:[%s1878_s1 + $0x1a0] sm:$0xff]  ;;  %v117_v57 = vld [vmem:[%s1878_s1 + $0x1c8] sm:$0xff] }
  0x2e   :  { %1182 = vmatpush1.bf16.msra.mxu0 %v1181_v45  ;;  %v115_v45 = vld [vmem:[%s1878_s1 + $0x1b8] sm:$0xff]  ;;  %v114_v56 = vld [vmem:[%s1878_s1 + $0x1b0] sm:$0xff]  ;;  %v1269_v60 = vpack.c.bf16 %v713_v49, %v711_v48  ;;  %v717_v1 = vld [vmem:[#allocation4 + $0xb0] sm:$0xff] }
  0x2f   :  { %1184 = vmatprep.subr.bf16.mxu0 %v1183_v46  ;;  %1262 = vmatpush1.bf16.msra.mxu1 %v1261_v34  ;;  %v1265_v46 = vpack.c.bf16 %v709_v37, %v707_v36  ;;  %v1207_v54 = vpack.c.bf16 %v115_v45, %v113_v44  ;;  %v1209_v2 = vpack.c.bf16 %v114_v56, %v112_v55  ;;  %v720_v3 = vld [vmem:[#allocation4 + $0xc8] sm:$0xff]  ;;  %v722_v4 = vld [vmem:[#allocation4 + $0xd8] sm:$0xff]  ;;  %v116_v6 = vld [vmem:[%s1878_s1 + $0x1c0] sm:$0xff] }
  0x30   :  { %1264 = vmatprep.subr.bf16.mxu1 %v1263_v35  ;;  %v118_v7 = vld [vmem:[%s1878_s1 + $0x1d0] sm:$0xff]  ;;  %v121_v8 = vld [vmem:[%s1878_s1 + $0x1e8] sm:$0xff]  ;;  %v123_v9 = vld [vmem:[%s1878_s1 + $0x1f8] sm:$0xff]  ;;  %v1275_v11 = vpack.c.bf16 %v722_v4, %v720_v3 }
  0x31   :  { %v721_v13 = vld [vmem:[#allocation4 + $0xd0] sm:$0xff]  ;;  %v1213_v14 = vpack.c.bf16 %v118_v7, %v116_v6  ;;  %v1215_v15 = vpack.c.bf16 %v123_v9, %v121_v8  ;;  %v122_v17 = vld [vmem:[%s1878_s1 + $0x1f0] sm:$0xff]  ;;  %v125_v18 = vld [vmem:[%s1878_s1 + $0x208] sm:$0xff] }
  0x32   :  { %1186 = vmatpush1.bf16.msra.mxu0 %v1185_v51  ;;  %v716_v51 = vld [vmem:[#allocation4 + $0xa8] sm:$0xff]  ;;  %v124_v23 = vld [vmem:[%s1878_s1 + $0x200] sm:$0xff]  ;;  %v126_v24 = vld [vmem:[%s1878_s1 + $0x210] sm:$0xff] }
  0x33   :  { %1188 = vmatprep.subr.bf16.mxu0 %v1187_v53  ;;  %v718_v53 = vld [vmem:[#allocation4 + $0xb8] sm:$0xff]  ;;  %1266 = vmatpush1.bf16.msra.mxu1 %v1265_v46  ;;  %v127_v19 = vld [vmem:[%s1878_s1 + $0x218] sm:$0xff]  ;;  %v48_v27 = vld [vmem:[#allocation2] sm:$0xff]  ;;  %v1221_v28 = vpack.c.bf16 %v126_v24, %v124_v23 }
  0x34   :  { %1268 = vmatprep.subr.bf16.mxu1 %v1267_v47  ;;  %v1271_v61 = vpack.c.bf16 %v718_v53, %v716_v51  ;;  %v1219_v22 = vpack.c.bf16 %v127_v19, %v125_v18  ;;  %v129_v25 = vld [vmem:[%s1878_s1 + $0x228] sm:$0xff]  ;;  %v128_v30 = vld [vmem:[%s1878_s1 + $0x220] sm:$0xff]  ;;  %v130_v31 = vld [vmem:[%s1878_s1 + $0x230] sm:$0xff] }
  0x35   :  { %v133_v32 = vld [vmem:[%s1878_s1 + $0x248] sm:$0xff]  ;;  %v135_v33 = vld [vmem:[%s1878_s1 + $0x258] sm:$0xff]  ;;  %v1225_v34 = vpack.c.bf16 %v130_v31, %v128_v30  ;;  %v132_v37 = vld [vmem:[%s1878_s1 + $0x240] sm:$0xff] }
  0x36   :  { %1190 = vmatpush1.bf16.msra.mxu0 %v1189_v59  ;;  %v119_v59 = vld [vmem:[%s1878_s1 + $0x1d8] sm:$0xff]  ;;  %v49_v35 = vld [vmem:[#allocation2 + $0x8] sm:$0xff]  ;;  %v1227_v36 = vpack.c.bf16 %v135_v33, %v133_v32  ;;  %v136_v43 = vld [vmem:[%s1878_s1 + $0x260] sm:$0xff] }
  0x37   :  { %1192 = vmatprep.subr.bf16.mxu0 %v1191_v63  ;;  %v715_v63 = vld [vmem:[#allocation4 + $0xa0] sm:$0xff]  ;;  %v1211_v5 = vpack.c.bf16 %v119_v59, %v117_v57  ;;  %1270 = vmatpush1.bf16.msra.mxu1 %v1269_v60  ;;  %v137_v39 = vld [vmem:[%s1878_s1 + $0x268] sm:$0xff]  ;;  %v139_v40 = vld [vmem:[%s1878_s1 + $0x278] sm:$0xff] }
  0x38   :  { %v1273_v10 = vpack.c.bf16 %v717_v1, %v715_v63  ;;  %1272 = vmatprep.subr.bf16.mxu1 %v1271_v61  ;;  %v1231_v42 = vpack.c.bf16 %v139_v40, %v137_v39  ;;  %v138_v44 = vld [vmem:[%s1878_s1 + $0x270] sm:$0xff]  ;;  %v141_v45 = vld [vmem:[%s1878_s1 + $0x288] sm:$0xff]  ;;  %v143_v46 = vld [vmem:[%s1878_s1 + $0x298] sm:$0xff] }
  0x39   :  { %v51_v47 = vld [vmem:[#allocation2 + $0x20] sm:$0xff]  ;;  %v1235_v48 = vpack.c.bf16 %v143_v46, %v141_v45  ;;  %v145_v51 = vld [vmem:[%s1878_s1 + $0x2a8] sm:$0xff]  ;;  %v147_v53 = vld [vmem:[%s1878_s1 + $0x2b8] sm:$0xff] }
  0x3a   :  { %1194 = vmatpush1.bf16.msra.mxu0 %v1193_v12  ;;  %v719_v12 = vld [vmem:[#allocation4 + $0xc0] sm:$0xff]  ;;  %v140_v49 = vld [vmem:[%s1878_s1 + $0x280] sm:$0xff]  ;;  %v149_v57 = vld [vmem:[%s1878_s1 + $0x2c8] sm:$0xff] }
  0x3b   :  { %1196 = vmatprep.subr.bf16.mxu0 %v1195_v16  ;;  %v120_v16 = vld [vmem:[%s1878_s1 + $0x1e0] sm:$0xff]  ;;  %1274 = vmatpush1.bf16.msra.mxu1 %v1273_v10  ;;  %v1277_v20 = vpack.c.bf16 %v721_v13, %v719_v12  ;;  %v146_v56 = vld [vmem:[%s1878_s1 + $0x2b0] sm:$0xff]  ;;  %v151_v59 = vld [vmem:[%s1878_s1 + $0x2d8] sm:$0xff] }
  0x3c   :  { %1276 = vmatprep.subr.bf16.mxu1 %v1275_v11  ;;  %v1217_v21 = vpack.c.bf16 %v122_v17, %v120_v16  ;;  %v144_v55 = vld [vmem:[%s1878_s1 + $0x2a0] sm:$0xff]  ;;  %v1243_v61 = vpack.c.bf16 %v151_v59, %v149_v57  ;;  %v150_v1 = vld [vmem:[%s1878_s1 + $0x2d0] sm:$0xff]  ;;  %v155_v3 = vld [vmem:[%s1878_s1 + $0x2f8] sm:$0xff] }
  0x3d   :  { %v1241_v60 = vpack.c.bf16 %v146_v56, %v144_v55  ;;  %v148_v63 = vld [vmem:[%s1878_s1 + $0x2c0] sm:$0xff]  ;;  %v154_v7 = vld [vmem:[%s1878_s1 + $0x2f0] sm:$0xff]  ;;  %v724_v13 = vld [vmem:[#allocation4 + $0xe8] sm:$0xff] }
  0x3e   :  { %1198 = vmatpush1.bf16.msra.mxu0 %v1197_v26  ;;  %v131_v26 = vld [vmem:[%s1878_s1 + $0x238] sm:$0xff]  ;;  %v1245_v4 = vpack.c.bf16 %v150_v1, %v148_v63  ;;  %v152_v6 = vld [vmem:[%s1878_s1 + $0x2e0] sm:$0xff]  ;;  %v57_v10 = vld [vmem:[#allocation2 + $0xa] sm:$0xff] }
  0x3f   :  { %1200 = vmatprep.subr.bf16.mxu0 %v1199_v29  ;;  %1278 = vmatpush1.bf16.msra.mxu1 %v1277_v20  ;;  %v1223_v29 = vpack.c.bf16 %v131_v26, %v129_v25  ;;  %v1249_v8 = vpack.c.bf16 %v154_v7, %v152_v6  ;;  %v56_v9 = vld [vmem:[#allocation2 + $0x2] sm:$0xff]  ;;  %v58_v11 = vld [vmem:[#allocation2 + $0x1a] sm:$0xff]  ;;  %v723_v16 = vld [vmem:[#allocation4 + $0xe0] sm:$0xff]  ;;  %v158_v7 = vlaneseq }
  0x40   :  { %v59_v12 = vld [vmem:[#allocation2 + $0x22] sm:$0xff]  ;;  %v728_v19 = vld [vmem:[#allocation4 + $0x108] sm:$0xff]  ;;  %v739_v40 = vld [vmem:[#allocation4 + $0x160] sm:$0xff] }
  0x41   :  { %v725_v17 = vld [vmem:[#allocation4 + $0xf0] sm:$0xff]  ;;  %v730_v20 = vld [vmem:[#allocation4 + $0x118] sm:$0xff]  ;;  %v732_v25 = vld [vmem:[#allocation4 + $0x128] sm:$0xff] }
  0x42   :  { %1202 = vmatpush1.bf16.msra.mxu0 %v1201_v38  ;;  %v134_v38 = vld [vmem:[%s1878_s1 + $0x250] sm:$0xff]  ;;  %v1281_v18 = vpack.c.bf16 %v725_v17, %v723_v16  ;;  %v729_v23 = vld [vmem:[#allocation4 + $0x110] sm:$0xff]  ;;  %v734_v26 = vld [vmem:[#allocation4 + $0x138] sm:$0xff] }
  0x43   :  { %1204 = vmatprep.subr.bf16.mxu0 %v1203_v41  ;;  %v50_v41 = vld [vmem:[#allocation2 + $0x18] sm:$0xff]  ;;  %v738_v32 = vld [vmem:[#allocation4 + $0x158] sm:$0xff]  ;;  %v743_v45 = vld [vmem:[#allocation4 + $0x180] sm:$0xff] }
  0x44   :  { %v736_v31 = vld [vmem:[#allocation4 + $0x148] sm:$0xff]  ;;  %v745_v46 = vld [vmem:[#allocation4 + $0x190] sm:$0xff]  ;;  %v751_v56 = vld [vmem:[#allocation4 + $0x1c0] sm:$0xff] }
  0x45   :  { %v1291_v33 = vpack.c.bf16 %v738_v32, %v736_v31  ;;  %v753_v57 = vld [vmem:[#allocation4 + $0x1d0] sm:$0xff]  ;;  %v755_v1 = vld [vmem:[#allocation4 + $0x1e0] sm:$0xff] }
  0x46   :  { %1206 = vmatpush1.bf16.msra.mxu0 %v1205_v50  ;;  %v142_v50 = vld [vmem:[%s1878_s1 + $0x290] sm:$0xff]  ;;  %v1309_v59 = vpack.c.bf16 %v753_v57, %v751_v56 }
  0x47   :  { %1208 = vmatprep.subr.bf16.mxu0 %v1207_v54  ;;  %v1239_v54 = vpack.c.bf16 %v147_v53, %v145_v51  ;;  %v749_v51 = vld [vmem:[#allocation4 + $0x1b0] sm:$0xff] }
  0x4a   :  { %1210 = vmatpush1.bf16.msra.mxu0 %v1209_v2  ;;  %v153_v2 = vld [vmem:[%s1878_s1 + $0x2e8] sm:$0xff] }
  0x4b   :  { %1212 = vmatprep.subr.bf16.mxu0 %v1211_v5  ;;  %v1247_v5 = vpack.c.bf16 %v155_v3, %v153_v2  ;;  %v757_v2 = vld [vmem:[#allocation4 + $0x1f0] sm:$0xff] }
  0x4c   :  { %v1313_v3 = vpack.c.bf16 %v757_v2, %v755_v1 }
  0x4e   :  { %1214 = vmatpush1.bf16.msra.mxu0 %v1213_v14  ;;  %v726_v14 = vld [vmem:[#allocation4 + $0xf8] sm:$0xff] }
  0x4f   :  { %1216 = vmatprep.subr.bf16.mxu0 %v1215_v15  ;;  %v1279_v15 = vpack.c.bf16 %v726_v14, %v724_v13 }
  0x51   :  { %1280 = vmatprep.subr.bf16.mxu1 %v1279_v15 }
  0x52   :  { %1218 = vmatpush1.bf16.msra.mxu0 %v1217_v21  ;;  %1282 = vmatpush1.bf16.msra.mxu1 %v1281_v18  ;;  %v1283_v21 = vpack.c.bf16 %v730_v20, %v728_v19 }
  0x53   :  { %1220 = vmatprep.subr.bf16.mxu0 %v1219_v22  ;;  %v727_v22 = vld [vmem:[#allocation4 + $0x100] sm:$0xff] }
  0x54   :  { %v1285_v24 = vpack.c.bf16 %v729_v23, %v727_v22  ;;  %1284 = vmatprep.subr.bf16.mxu1 %v1283_v21 }
  0x55   :  { %233 = vmatmul.mubr.f32.vlgmr.msra.gmra.mrb[0].mxu0 %v48_v27  ;;  %v1287_v27 = vpack.c.bf16 %v734_v26, %v732_v25 }
  0x56   :  { %1222 = vmatpush1.bf16.msra.mxu0 %v1221_v28  ;;  %238 = vmatprep.mubr.f32.mxu0 %v1568_v52  ;;  %v1229_v52 = vpack.c.bf16 %v134_v38, %v132_v37  ;;  %v731_v28 = vld [vmem:[#allocation4 + $0x120] sm:$0xff]  ;;  %v740_v37 = vld [vmem:[#allocation4 + $0x168] sm:$0xff]  ;;  %v742_v38 = vld [vmem:[#allocation4 + $0x178] sm:$0xff] }
  0x57   :  { %1224 = vmatprep.subr.bf16.mxu0 %v1223_v29  ;;  %1286 = vmatpush1.bf16.msra.mxu1 %v1285_v24  ;;  %v733_v29 = vld [vmem:[#allocation4 + $0x130] sm:$0xff]  ;;  %v1295_v39 = vpack.c.bf16 %v742_v38, %v740_v37 }
  0x58   :  { %v1289_v30 = vpack.c.bf16 %v733_v29, %v731_v28  ;;  %1288 = vmatprep.subr.bf16.mxu1 %v1287_v27 }
  0x59   :  { %239 = vmatmul.mubr.f32.gmra.mrb[2].mxu0 %v49_v35  ;;  %v737_v35 = vld [vmem:[#allocation4 + $0x150] sm:$0xff] }
  0x5a   :  { %1226 = vmatpush1.bf16.msra.mxu0 %v1225_v34  ;;  %244 = vmatprep.mubr.f32.mxu0 %v1586_v58  ;;  %v1233_v58 = vpack.c.bf16 %v138_v44, %v136_v43  ;;  %v735_v34 = vld [vmem:[#allocation4 + $0x140] sm:$0xff]  ;;  %v746_v43 = vld [vmem:[#allocation4 + $0x198] sm:$0xff] }
  0x5b   :  { %1228 = vmatprep.subr.bf16.mxu0 %v1227_v36  ;;  %1290 = vmatpush1.bf16.msra.mxu1 %v1289_v30  ;;  %v1293_v36 = vpack.c.bf16 %v737_v35, %v735_v34 }
  0x5c   :  { %1292 = vmatprep.subr.bf16.mxu1 %v1291_v33 }
  0x5d   :  { %245 = vmatmul.mubr.f32.gmra.mrb[4].mxu0 %v50_v41 }
  0x5e   :  { %1230 = vmatpush1.bf16.msra.mxu0 %v1229_v52  ;;  %250 = vmatprep.mubr.f32.mxu0 %v1598_v62  ;;  %v1237_v62 = vpack.c.bf16 %v142_v50, %v140_v49  ;;  %v741_v52 = vld [vmem:[#allocation4 + $0x170] sm:$0xff]  ;;  %v747_v50 = vld [vmem:[#allocation4 + $0x1a0] sm:$0xff] }
  0x5f   :  { %1232 = vmatprep.subr.bf16.mxu0 %v1231_v42  ;;  %1294 = vmatpush1.bf16.msra.mxu1 %v1293_v36  ;;  %v1297_v41 = vpack.c.bf16 %v741_v52, %v739_v40  ;;  %v744_v42 = vld [vmem:[#allocation4 + $0x188] sm:$0xff]  ;;  %v1305_v53 = vpack.c.bf16 %v749_v51, %v747_v50 }
  0x60   :  { %1296 = vmatprep.subr.bf16.mxu1 %v1295_v39  ;;  %v1299_v44 = vpack.c.bf16 %v746_v43, %v744_v42 }
  0x61   :  { %251 = vmatmul.mubr.f32.gmra.mrb[6].mxu0 %v51_v47  ;;  %v748_v47 = vld [vmem:[#allocation4 + $0x1a8] sm:$0xff] }
  0x62   :  { %1234 = vmatpush1.bf16.msra.mxu0 %v1233_v58  ;;  %321 = vmatprep.mubr.f32.mxu0 %v1403_v0  ;;  %v1301_v58 = vpack.c.bf16 %v745_v46, %v743_v45 }
  0x63   :  { %1236 = vmatprep.subr.bf16.mxu0 %v1235_v48  ;;  %1298 = vmatpush1.bf16.msra.mxu1 %v1297_v41  ;;  %v750_v48 = vld [vmem:[#allocation4 + $0x1b8] sm:$0xff] }
  0x64   :  { %1300 = vmatprep.subr.bf16.mxu1 %v1299_v44  ;;  %v1303_v49 = vpack.c.bf16 %v750_v48, %v748_v47 }
  0x66   :  { %1238 = vmatpush1.bf16.msra.mxu0 %v1237_v62  ;;  %v752_v62 = vld [vmem:[#allocation4 + $0x1c8] sm:$0xff] }
  0x67   :  { %1240 = vmatprep.subr.bf16.mxu0 %v1239_v54  ;;  %1302 = vmatpush1.bf16.msra.mxu1 %v1301_v58  ;;  %v754_v54 = vld [vmem:[#allocation4 + $0x1d8] sm:$0xff] }
  0x68   :  { %1304 = vmatprep.subr.bf16.mxu1 %v1303_v49  ;;  %v1307_v55 = vpack.c.bf16 %v754_v54, %v752_v62 }
  0x6a   :  { %1242 = vmatpush1.bf16.msra.mxu0 %v1241_v60  ;;  %v756_v60 = vld [vmem:[#allocation4 + $0x1e8] sm:$0xff] }
  0x6b   :  { %1244 = vmatprep.subr.bf16.mxu0 %v1243_v61  ;;  %1306 = vmatpush1.bf16.msra.mxu1 %v1305_v53  ;;  %v758_v61 = vld [vmem:[#allocation4 + $0x1f8] sm:$0xff] }
  0x6c   :  { %1308 = vmatprep.subr.bf16.mxu1 %v1307_v55  ;;  %v1311_v63 = vpack.c.bf16 %v758_v61, %v756_v60 }
  0x6e   :  { %1246 = vmatpush1.bf16.msra.mxu0 %v1245_v4  ;;  %v760_v4 = vld [vmem:[#allocation4 + $0x208] sm:$0xff] }
  0x6f   :  { %1248 = vmatprep.subr.bf16.mxu0 %v1247_v5  ;;  %1310 = vmatpush1.bf16.msra.mxu1 %v1309_v59  ;;  %v762_v5 = vld [vmem:[#allocation4 + $0x218] sm:$0xff] }
  0x70   :  { %1312 = vmatprep.subr.bf16.mxu1 %v1311_v63  ;;  %v1315_v6 = vpack.c.bf16 %v762_v5, %v760_v4 }
  0x72   :  { %1250 = vmatpush1.bf16.msra.mxu0 %v1249_v8  ;;  %v1776_v8 = vshrl.u32 %v158_v7, 7 }
  0x73   :  { %1314 = vmatpush1.bf16.msra.mxu1 %v1313_v3 }
  0x74   :  { %1316 = vmatprep.subr.bf16.mxu1 %v1315_v6 }
  0x75   :  { %322 = vmatmul.mubr.f32.vlgmr.msra.gmra.mrb[0].mxu0 %v56_v9  ;;  %v1779_v9 = vsub.s32 0, %v1776_v8 }
  0x76   :  { %327 = vmatprep.mubr.f32.mxu0 %v1403_v0 }
  0x79   :  { %328 = vmatmul.mubr.f32.gmra.mrb[2].mxu0 %v57_v10  ;;  %v156_v10 = vld [vmem:[%s1879_s2] sm:$0x3] }
  0x7a   :  { %333 = vmatprep.mubr.f32.mxu0 %v1403_v0  ;;  %v1786_v14 = vrot.slane %v156_v10, %v1779_v9 }
  0x7d   :  { %334 = vmatmul.mubr.f32.gmra.mrb[4].mxu0 %v58_v11  ;;  %v164_v11 = vsub.s32 1, %v1776_v8 }
  0x7e   :  { %339 = vmatprep.mubr.f32.mxu0 %v1403_v0 }
  0x7f   :  { %v1790_v15 = vrot.slane %v156_v10, %v164_v11 }
  0x81   :  { %340 = vmatmul.mubr.f32.gmra.mrb[6].mxu0 %v59_v12  ;;  %v1404_v12 = vmov 1983009808  }
  0x82   :  { %v365_v13 = vunpack.c.l.s4 %v1404_v12 }
  0x84   :  { %v366_v17 = vunpack.c.0.s8 %v365_v13 }
  0x86   :  { %v1795_v23 = vsub.s32 %v366_v17, %v1776_v8 }
 0x148   :  { %v323_v16 = vpop.f32.mrb[0].mxu0 }
 0x149   :  { %v1347_v18 = vadd.f32 %v323_v16, %v1786_v14  ;;  %v325_v19 = vpop.f32.mrb[1].mxu0 }
 0x14a   :  { %v1348_v20 = vadd.f32 %v325_v19, %v1790_v15 }
 0x14b   :  { %v346_v21 = vmax.f32 %v1347_v18, 0.0 }
 0x14c   :  { %v347_v22 = vmax.f32 %v1348_v20, 0.0  ;;  %v329_v24 = vpop.f32.mrb[2].mxu0 }
 0x14d   :  { %v1349_v25 = vadd.f32 %v329_v24, %v1786_v14  ;;  %v331_v26 = vpop.f32.mrb[3].mxu0 }
 0x14e   :  { %v362_v27 = vcombine.low %v346_v21, %v347_v22  ;;  %v363_v28 = vcombine.high %v346_v21, %v347_v22  ;;  %v1350_v29 = vadd.f32 %v331_v26, %v1790_v15 }
 0x14f   :  { %v348_v30 = vmax.f32 %v1349_v25, 0.0 }
 0x150   :  { %v370_v31 = vrot.slane %v362_v27, %v1795_v23  ;;  %v377_v32 = vrot.slane %v363_v28, %v1795_v23  ;;  %v349_v33 = vmax.f32 %v1350_v29, 0.0  ;;  %v335_v34 = vpop.f32.mrb[4].mxu0 }
 0x151   :  { %v1351_v35 = vadd.f32 %v335_v34, %v1786_v14  ;;  %v337_v36 = vpop.f32.mrb[5].mxu0 }
 0x152   :  { %v378_v37 = vcombine.high %v370_v31, %v370_v31  ;;  %v379_v38 = vcombine.high %v377_v32, %v377_v32  ;;  %v1131_v39 = vrot.slane %v370_v31, 9  ;;  %v1133_v40 = vrot.slane %v377_v32, 9 }
 0x153   :  { %v380_v52 = vcombine.low %v348_v30, %v349_v33  ;;  %v381_v41 = vcombine.high %v348_v30, %v349_v33  ;;  %v1352_v42 = vadd.f32 %v337_v36, %v1790_v15  ;;  %v350_v49 = vmax.f32 %v1351_v35, 0.0 }
 0x154   :  { %v1132_v43 = vrot.slane %v378_v37, 9  ;;  %v1134_v44 = vrot.slane %v379_v38, 9  ;;  %v498_v45 = vmax.f32 %v370_v31, %v1131_v39  ;;  %v500_v46 = vmax.f32 %v377_v32, %v1133_v40  ;;  %v341_v58 = vpop.f32.mrb[6].mxu0 }
 0x155   :  { %v388_v47 = vrot.slane %v380_v52, %v1795_v23  ;;  %v395_v48 = vrot.slane %v381_v41, %v1795_v23  ;;  %v351_v50 = vmax.f32 %v1352_v42, 0.0  ;;  %v343_v51 = vpop.f32.mrb[7].mxu0  ;;  %v1353_v13 = vadd.f32 %v341_v58, %v1786_v14 }
 0x156   :  { %v499_v53 = vmax.f32 %v378_v37, %v1132_v43  ;;  %v501_v62 = vmax.f32 %v379_v38, %v1134_v44  ;;  %v530_v54 = vrot.slane %v498_v45, 2  ;;  %v532_v55 = vrot.slane %v500_v46, 2 }
 0x157   :  { %v396_v56 = vcombine.high %v388_v47, %v388_v47  ;;  %v397_v57 = vcombine.high %v395_v48, %v395_v48  ;;  %v1135_v59 = vrot.slane %v388_v47, 9  ;;  %v1137_v60 = vrot.slane %v395_v48, 9 }
 0x158   :  { %v531_v61 = vrot.slane %v499_v53, 2  ;;  %v533_v63 = vrot.slane %v501_v62, 2  ;;  %v562_v1 = vmax.f32 %v498_v45, %v530_v54  ;;  %v564_v2 = vmax.f32 %v500_v46, %v532_v55 }
 0x159   :  { %v1136_v3 = vrot.slane %v396_v56, 9  ;;  %v1138_v4 = vrot.slane %v397_v57, 9  ;;  %v502_v5 = vmax.f32 %v388_v47, %v1135_v59  ;;  %v504_v6 = vmax.f32 %v395_v48, %v1137_v60 }
 0x15a   :  { %v563_v7 = vmax.f32 %v499_v53, %v531_v61  ;;  %v565_v10 = vmax.f32 %v501_v62, %v533_v63  ;;  %v597_v12 = vrot.slane %v562_v1, %v1779_v9  ;;  %v605_v21 = vrot.slane %v564_v2, %v1779_v9  ;;  %v759_v63 = vld [vmem:[#allocation4 + $0x200] sm:$0xff]  ;;  %v761_v1 = vld [vmem:[#allocation4 + $0x210] sm:$0xff] }
 0x15b   :  { %v503_v16 = vmax.f32 %v396_v56, %v1136_v3  ;;  %v505_v17 = vmax.f32 %v397_v57, %v1138_v4  ;;  %v534_v18 = vrot.slane %v502_v5, 2  ;;  %v536_v19 = vrot.slane %v504_v6, 2 }
 0x15c   :  { %v601_v20 = vrot.slane %v563_v7, %v1779_v9  ;;  %v398_v22 = vcombine.low %v350_v49, %v351_v50  ;;  %v399_v24 = vcombine.high %v350_v49, %v351_v50  ;;  %v609_v29 = vrot.slane %v565_v10, %v1779_v9  ;;  %v764_v7 = vld [vmem:[#allocation4 + $0x228] sm:$0xff]  ;;  %v766_v10 = vld [vmem:[#allocation4 + $0x238] sm:$0xff] }
 0x15d   :  { %v535_v25 = vrot.slane %v503_v16, 2  ;;  %v537_v26 = vrot.slane %v505_v17, 2  ;;  %v566_v27 = vmax.f32 %v502_v5, %v534_v18  ;;  %v568_v28 = vmax.f32 %v504_v6, %v536_v19 }
 0x15e   :  { %v659_v30 = vsel %vm658_vm0, %v601_v20, %v597_v12  ;;  %v406_v14 = vrot.slane %v398_v22, %v1795_v23  ;;  %v413_v31 = vrot.slane %v399_v24, %v1795_v23  ;;  %v1354_v45 = vadd.f32 %v343_v51, %v1790_v15 }
 0x15f   :  { %v661_v32 = vsel %vm660_vm1, %v605_v21, %v659_v30  ;;  %v567_v33 = vmax.f32 %v503_v16, %v535_v25  ;;  %v569_v34 = vmax.f32 %v505_v17, %v537_v26  ;;  %v613_v35 = vrot.slane %v566_v27, %v1779_v9  ;;  %v763_v26 = vld [vmem:[#allocation4 + $0x220] sm:$0xff]  ;;  %v765_v27 = vld [vmem:[#allocation4 + $0x230] sm:$0xff] }
 0x160   :  { %v663_v36 = vsel %vm662_vm2, %v609_v29, %v661_v32  ;;  %v414_v37 = vcombine.high %v406_v14, %v406_v14  ;;  %v415_v38 = vcombine.high %v413_v31, %v413_v31  ;;  %v621_v40 = vrot.slane %v568_v28, %v1779_v9  ;;  %v768_v32 = vld [vmem:[#allocation4 + $0x248] sm:$0xff] }
 0x161   :  { %v617_v39 = vrot.slane %v567_v33, %v1779_v9  ;;  %v665_v52 = vsel %vm664_vm3, %v613_v35, %v663_v36  ;;  %v1139_v41 = vrot.slane %v406_v14, 9  ;;  %v1141_v43 = vrot.slane %v413_v31, 9  ;;  %v770_v33 = vld [vmem:[#allocation4 + $0x258] sm:$0xff] }
 0x162   :  { %v1140_v42 = vrot.slane %v414_v37, 9  ;;  %v1142_v44 = vrot.slane %v415_v38, 9  ;;  %v625_v46 = vrot.slane %v569_v34, %v1779_v9  ;;  %v352_v48 = vmax.f32 %v1353_v13, 0.0 }
 0x163   :  { %v667_v58 = vsel %vm666_vm4, %v617_v39, %v665_v52  ;;  %v506_v47 = vmax.f32 %v406_v14, %v1139_v41  ;;  %v508_v53 = vmax.f32 %v413_v31, %v1141_v43  ;;  %v353_v56 = vmax.f32 %v1354_v45, 0.0  ;;  %v767_v41 = vld [vmem:[#allocation4 + $0x240] sm:$0xff] }
 0x164   :  { %v669_v49 = vsel %vm668_vm5, %v621_v40, %v667_v58  ;;  %v507_v50 = vmax.f32 %v414_v37, %v1140_v42  ;;  %v509_v62 = vmax.f32 %v415_v38, %v1142_v44  ;;  %v1317_v17 = vpack.c.bf16 %v761_v1, %v759_v63  ;;  %v769_v42 = vld [vmem:[#allocation4 + $0x250] sm:$0xff]  ;;  %v774_v58 = vld [vmem:[#allocation4 + $0x278] sm:$0xff] }
 0x165   :  { %v671_v54 = vsel %vm670_vm6, %v625_v46, %v669_v49  ;;  %v538_v55 = vrot.slane %v506_v47, 2  ;;  %v540_v51 = vrot.slane %v508_v53, 2  ;;  %v416_v60 = vcombine.low %v352_v48, %v353_v56  ;;  %v772_v46 = vld [vmem:[#allocation4 + $0x268] sm:$0xff] }
 0x166   :  { %681 = vst [vmem:[%s1882_s5] sm:$0xff] %v671_v54  ;;  %687 = vst [vmem:[#allocation3 + $0x1] sm:$0xff] %v671_v54  ;;  %v539_v15 = vrot.slane %v507_v50, 2  ;;  %v541_v57 = vrot.slane %v509_v62, 2  ;;  %867 = vmatprep.mubr.f32.mxu1 %v671_v54  ;;  %v417_v61 = vcombine.high %v352_v48, %v353_v56  ;;  %v1319_v25 = vpack.c.bf16 %v766_v10, %v764_v7  ;;  %v771_v54 = vld [vmem:[#allocation4 + $0x260] sm:$0xff]  ;;  %v782_v7 = vld [vmem:[#allocation4 + $0x2b8] sm:$0xff] }
 0x167   :  { %v570_v59 = vmax.f32 %v506_v47, %v538_v55  ;;  %v572_v3 = vmax.f32 %v508_v53, %v540_v51  ;;  %v424_v5 = vrot.slane %v416_v60, %v1795_v23  ;;  %v1321_v39 = vpack.c.bf16 %v765_v27, %v763_v26  ;;  %v773_v55 = vld [vmem:[#allocation4 + $0x270] sm:$0xff]  ;;  %v776_v51 = vld [vmem:[#allocation4 + $0x288] sm:$0xff]  ;;  %v790_v26 = vld [vmem:[#allocation4 + $0x2f8] sm:$0xff] }
 0x168   :  { %v571_v2 = vmax.f32 %v507_v50, %v539_v15  ;;  %v573_v4 = vmax.f32 %v509_v62, %v541_v57  ;;  %v431_v6 = vrot.slane %v417_v61, %v1795_v23  ;;  %v1323_v52 = vpack.c.bf16 %v770_v33, %v768_v32  ;;  %v778_v57 = vld [vmem:[#allocation4 + $0x298] sm:$0xff]  ;;  %v791_v33 = vld [vmem:[%s1881_s4] sm:$0x3] }
 0x169   :  { %v629_v12 = vrot.slane %v570_v59, %v1779_v9  ;;  %v637_v16 = vrot.slane %v572_v3, %v1779_v9  ;;  %v432_v18 = vcombine.high %v424_v5, %v424_v5  ;;  %v1143_v20 = vrot.slane %v424_v5, 9  ;;  %v775_v3 = vld [vmem:[#allocation4 + $0x280] sm:$0xff] }
 0x16a   :  { %v633_v13 = vrot.slane %v571_v2, %v1779_v9  ;;  %v433_v19 = vcombine.high %v431_v6, %v431_v6  ;;  %v1145_v21 = vrot.slane %v431_v6, 9  ;;  %v641_v22 = vrot.slane %v573_v4, %v1779_v9  ;;  %v777_v4 = vld [vmem:[#allocation4 + $0x290] sm:$0xff] }
 0x16b   :  { %v1144_v29 = vrot.slane %v432_v18, 9  ;;  %v510_v14 = vmax.f32 %v424_v5, %v1143_v20  ;;  %v1325_v53 = vpack.c.bf16 %v769_v42, %v767_v41  ;;  %v1327_v62 = vpack.c.bf16 %v774_v58, %v772_v46 }
 0x16c   :  { %v672_v24 = vsel %vm658_vm0, %v633_v13, %v629_v12  ;;  %v1146_v30 = vrot.slane %v433_v19, 9  ;;  %v512_v35 = vmax.f32 %v431_v6, %v1145_v21  ;;  %v1329_v63 = vpack.c.bf16 %v773_v55, %v771_v54  ;;  %v780_v6 = vld [vmem:[#allocation4 + $0x2a8] sm:$0xff]  ;;  %v779_v13 = vld [vmem:[#allocation4 + $0x2a0] sm:$0xff] }
 0x16d   :  { %v673_v28 = vsel %vm660_vm1, %v637_v16, %v672_v24  ;;  %v689_v31 = vld [vmem:[#allocation3] sm:$0xff]  ;;  %v511_v36 = vmax.f32 %v432_v18, %v1144_v29  ;;  %v542_v38 = vrot.slane %v510_v14, 2  ;;  %v1331_v2 = vpack.c.bf16 %v778_v57, %v776_v51  ;;  %v781_v16 = vld [vmem:[#allocation4 + $0x2b0] sm:$0xff]  ;;  %v786_v18 = vld [vmem:[#allocation4 + $0x2d8] sm:$0xff] }
 0x16e   :  { %v674_v34 = vsel %vm662_vm2, %v641_v22, %v673_v28  ;;  %868 = vmatmul.mubr.f32.vlgmr.msra.gmra.mrb[0].mxu1 %v689_v31  ;;  %v513_v37 = vmax.f32 %v433_v19, %v1146_v30  ;;  %v544_v40 = vrot.slane %v512_v35, 2  ;;  %v1333_v10 = vpack.c.bf16 %v777_v4, %v775_v3  ;;  %v783_v21 = vld [vmem:[#allocation4 + $0x2c0] sm:$0xff]  ;;  %v785_v22 = vld [vmem:[#allocation4 + $0x2d0] sm:$0xff] }
 0x16f   :  { %1318 = vmatpush1.bf16.msra.mxu1 %v1317_v17  ;;  %v543_v43 = vrot.slane %v511_v36, 2  ;;  %v574_v45 = vmax.f32 %v510_v14, %v542_v38  ;;  %v1335_v12 = vpack.c.bf16 %v782_v7, %v780_v6  ;;  %v784_v17 = vld [vmem:[#allocation4 + $0x2c8] sm:$0xff]  ;;  %v1337_v19 = vpack.c.bf16 %v781_v16, %v779_v13  ;;  %v787_v29 = vld [vmem:[#allocation4 + $0x2e0] sm:$0xff]  ;;  %v789_v30 = vld [vmem:[#allocation4 + $0x2f0] sm:$0xff] }
 0x170   :  { %1320 = vmatprep.subr.bf16.mxu1 %v1319_v25  ;;  %v545_v44 = vrot.slane %v513_v37, 2  ;;  %v576_v47 = vmax.f32 %v512_v35, %v544_v40  ;;  %v1339_v20 = vpack.c.bf16 %v786_v18, %v784_v17  ;;  %v788_v25 = vld [vmem:[#allocation4 + $0x2e8] sm:$0xff]  ;;  %v1341_v27 = vpack.c.bf16 %v785_v22, %v783_v21 }
 0x171   :  { %v575_v48 = vmax.f32 %v511_v36, %v543_v43  ;;  %v645_v50 = vrot.slane %v574_v45, %v1779_v9  ;;  %v1343_v28 = vpack.c.bf16 %v790_v26, %v788_v25  ;;  %v1345_v14 = vpack.c.bf16 %v789_v30, %v787_v29  ;;  %v693_v31 = vld [vmem:[#allocation3 + $0x2] sm:$0xff] }
 0x172   :  { %v577_v49 = vmax.f32 %v513_v37, %v545_v44  ;;  %v653_v59 = vrot.slane %v576_v47, %v1779_v9  ;;  %v800_v35 = vrot.slane %v791_v33, %v164_v11 }
 0x173   :  { %1322 = vmatpush1.bf16.msra.mxu1 %v1321_v39  ;;  %v649_v56 = vrot.slane %v575_v48, %v1779_v9  ;;  %v675_v15 = vsel %vm664_vm3, %v645_v50, %v674_v34  ;;  %v796_v34 = vrot.slane %v791_v33, %v1779_v9 }
 0x174   :  { %1324 = vmatprep.subr.bf16.mxu1 %v1323_v52  ;;  %v657_v60 = vrot.slane %v577_v49, %v1779_v9 }
 0x175   :  { %v676_v61 = vsel %vm666_vm4, %v649_v56, %v675_v15 }
 0x176   :  { %v677_v1 = vsel %vm668_vm5, %v653_v59, %v676_v61 }
 0x177   :  { %1326 = vmatpush1.bf16.msra.mxu1 %v1325_v53  ;;  %v678_v5 = vsel %vm670_vm6, %v657_v60, %v677_v1 }
 0x178   :  { %1328 = vmatprep.subr.bf16.mxu1 %v1327_v62  ;;  %682 = vst [vmem:[%s1882_s5 + $0x8] sm:$0xff] %v678_v5  ;;  %688 = vst [vmem:[#allocation3 + $0x11] sm:$0xff] %v678_v5  ;;  %873 = vmatprep.mubr.f32.mxu1 %v678_v5 }
 0x17b   :  { %1330 = vmatpush1.bf16.msra.mxu1 %v1329_v63 }
 0x17c   :  { %1332 = vmatprep.subr.bf16.mxu1 %v1331_v2 }
 0x17f   :  { %1334 = vmatpush1.bf16.msra.mxu1 %v1333_v10  ;;  %v690_v24 = vld [vmem:[#allocation3 + $0x10] sm:$0xff] }
 0x180   :  { %1336 = vmatprep.subr.bf16.mxu1 %v1335_v12  ;;  %874 = vmatmul.mubr.f32.gmra.mrb[2].mxu1 %v690_v24  ;;  %v694_v32 = vld [vmem:[#allocation3 + $0x12] sm:$0xff] }
 0x181   :  { %944 = vmatprep.mubr.f32.mxu1 %v1403_v0 }
 0x183   :  { %1338 = vmatpush1.bf16.msra.mxu1 %v1337_v19 }
 0x184   :  { %1340 = vmatprep.subr.bf16.mxu1 %v1339_v20 }
 0x187   :  { %1342 = vmatpush1.bf16.msra.mxu1 %v1341_v27 }
 0x188   :  { %1344 = vmatprep.subr.bf16.mxu1 %v1343_v28 }
 0x18b   :  { %1346 = vmatpush1.bf16.msra.mxu1 %v1345_v14 }
 0x18e   :  { %945 = vmatmul.mubr.f32.vlgmr.msra.gmra.mrb[0].mxu1 %v693_v31 }
 0x18f   :  { %950 = vmatprep.mubr.f32.mxu1 %v1403_v0 }
 0x192   :  { %951 = vmatmul.mubr.f32.gmra.mrb[2].mxu1 %v694_v32 }
 0x261   :  { %v946_v36 = vpop.f32.mrb[0].mxu1 }
 0x262   :  { %v1355_v37 = vadd.f32 %v946_v36, %v796_v34  ;;  %v948_v38 = vpop.f32.mrb[1].mxu1 }
 0x263   :  { %v1356_v39 = vadd.f32 %v948_v38, %v800_v35 }
 0x264   :  { %v957_v40 = vmax.f32 %v1355_v37, 0.0 }
 0x265   :  { %v958_v52 = vmax.f32 %v1356_v39, 0.0  ;;  %v952_v41 = vpop.f32.mrb[2].mxu1 }
 0x266   :  { %v1357_v42 = vadd.f32 %v952_v41, %v796_v34  ;;  %v954_v0 = vpop.f32.mrb[3].mxu1 }
 0x267   :  { %v965_v43 = vcombine.low %v957_v40, %v958_v52  ;;  %v966_v44 = vcombine.high %v957_v40, %v958_v52  ;;  %v1358_v45 = vadd.f32 %v954_v0, %v800_v35 }
 0x268   :  { %v959_v46 = vmax.f32 %v1357_v42, 0.0 }
 0x269   :  { %v973_v58 = vrot.slane %v965_v43, %v1795_v23  ;;  %v980_v47 = vrot.slane %v966_v44, %v1795_v23  ;;  %v960_v48 = vmax.f32 %v1358_v45, 0.0 }
 0x26b   :  { %v981_v8 = vcombine.high %v973_v58, %v973_v58  ;;  %v982_v11 = vcombine.high %v980_v47, %v980_v47  ;;  %v1147_v49 = vrot.slane %v973_v58, 9  ;;  %v1149_v50 = vrot.slane %v980_v47, 9 }
 0x26c   :  { %v983_v53 = vcombine.low %v959_v46, %v960_v48  ;;  %v984_v62 = vcombine.high %v959_v46, %v960_v48 }
 0x26d   :  { %v1148_v54 = vrot.slane %v981_v8, 9  ;;  %v1150_v55 = vrot.slane %v982_v11, 9  ;;  %v1033_v56 = vmax.f32 %v973_v58, %v1147_v49  ;;  %v1035_v15 = vmax.f32 %v980_v47, %v1149_v50 }
 0x26e   :  { %v991_v51 = vrot.slane %v983_v53, %v1795_v23  ;;  %v998_v57 = vrot.slane %v984_v62, %v1795_v23 }
 0x26f   :  { %v1034_v59 = vmax.f32 %v981_v8, %v1148_v54  ;;  %v1036_v60 = vmax.f32 %v982_v11, %v1150_v55  ;;  %v1049_v61 = vrot.slane %v1033_v56, 2  ;;  %v1051_v63 = vrot.slane %v1035_v15, 2 }
 0x270   :  { %v999_v1 = vcombine.high %v991_v51, %v991_v51  ;;  %v1000_v2 = vcombine.high %v998_v57, %v998_v57  ;;  %v1151_v3 = vrot.slane %v991_v51, 9  ;;  %v1153_v4 = vrot.slane %v998_v57, 9 }
 0x271   :  { %v1050_v5 = vrot.slane %v1034_v59, 2  ;;  %v1052_v6 = vrot.slane %v1036_v60, 2  ;;  %v1065_v7 = vmax.f32 %v1033_v56, %v1049_v61  ;;  %v1067_v10 = vmax.f32 %v1035_v15, %v1051_v63 }
 0x272   :  { %v1152_v12 = vrot.slane %v999_v1, 9  ;;  %v1154_v13 = vrot.slane %v1000_v2, 9  ;;  %v1037_v16 = vmax.f32 %v991_v51, %v1151_v3  ;;  %v1039_v17 = vmax.f32 %v998_v57, %v1153_v4 }
 0x273   :  { %v1066_v18 = vmax.f32 %v1034_v59, %v1050_v5  ;;  %v1068_v19 = vmax.f32 %v1036_v60, %v1052_v6  ;;  %v1084_v24 = vrot.slane %v1065_v7, %v1779_v9  ;;  %v1092_v26 = vrot.slane %v1067_v10, %v1779_v9 }
 0x274   :  { %v1038_v20 = vmax.f32 %v999_v1, %v1152_v12  ;;  %v1040_v23 = vmax.f32 %v1000_v2, %v1154_v13  ;;  %v1053_v21 = vrot.slane %v1037_v16, 2  ;;  %v1055_v22 = vrot.slane %v1039_v17, 2 }
 0x275   :  { %v1088_v25 = vrot.slane %v1066_v18, %v1779_v9  ;;  %v1096_v30 = vrot.slane %v1068_v19, %v1779_v9 }
 0x276   :  { %v1054_v27 = vrot.slane %v1038_v20, 2  ;;  %v1056_v28 = vrot.slane %v1040_v23, 2  ;;  %v1069_v29 = vmax.f32 %v1037_v16, %v1053_v21  ;;  %v1071_v31 = vmax.f32 %v1039_v17, %v1055_v22 }
 0x277   :  { %v1113_v14 = vsel %vm658_vm0, %v1088_v25, %v1084_v24 }
 0x278   :  { %v1114_v32 = vsel %vm660_vm1, %v1092_v26, %v1113_v14  ;;  %v1070_v33 = vmax.f32 %v1038_v20, %v1054_v27  ;;  %v1072_v34 = vmax.f32 %v1040_v23, %v1056_v28  ;;  %v1100_v35 = vrot.slane %v1069_v29, %v1779_v9 }
 0x279   :  { %v1115_v36 = vsel %vm662_vm2, %v1096_v30, %v1114_v32  ;;  %v1108_v39 = vrot.slane %v1071_v31, %v1779_v9 }
 0x27a   :  { %v1104_v37 = vrot.slane %v1070_v33, %v1779_v9  ;;  %v1116_v38 = vsel %vm664_vm3, %v1100_v35, %v1115_v36  ;;  %v1112_v40 = vrot.slane %v1072_v34, %v1779_v9 }
 0x27c   :  { %v1117_v52 = vsel %vm666_vm4, %v1104_v37, %v1116_v38 }
 0x27d   :  { %v1118_v41 = vsel %vm668_vm5, %v1108_v39, %v1117_v52 }
 0x27e   :  { %v1119_v42 = vsel %vm670_vm6, %v1112_v40, %v1118_v41 }
 0x27f   :  { %1121 = vst [vmem:[%s1883_s6] sm:$0xff] %v1119_v42 }
 0x280   :  { %1130 = vsyncpa [#allocation5], 1 }

</bundles_post_ra>
